<compile_context>
chip_gen: v5e
topology: v5e:2x2
jax: 0.10.0
libtpu: 0.0.40
codegen_flags: <defaults>
</compile_context>

<pallas_src>
import functools

import jax
import jax.numpy as jnp
from jax.experimental import pallas as pl
from jax.experimental.pallas import tpu as pltpu

SUB = 8      # sublane count of a vreg (batch tiles must be multiples of this)


def _round_up(x, m):
    return ((x + m - 1) // m) * m


# ---------------------------------------------------------------------------
# Kernel: one batch tile of x through all three layers, fully in VMEM.
# ---------------------------------------------------------------------------
def _qnet_kernel(x_ref, w1_ref, w2_ref, w3_ref, b_ref, o_ref):
    hidden = w1_ref.shape[1]
    action = w3_ref.shape[1]

    # fc1 + relu (bf16 MXU inputs, f32 accumulation / epilogue)
    x = x_ref[...].astype(jnp.bfloat16)
    h = jnp.dot(x, w1_ref[...], preferred_element_type=jnp.float32)
    h = jnp.maximum(h + b_ref[0:1, :hidden], 0.0)
    # fc2 + relu
    h = jnp.dot(h.astype(jnp.bfloat16), w2_ref[...],
                preferred_element_type=jnp.float32)
    h = jnp.maximum(h + b_ref[1:2, :hidden], 0.0)
    # fc3 (no activation)
    out = jnp.dot(h.astype(jnp.bfloat16), w3_ref[...],
                  preferred_element_type=jnp.float32)
    o_ref[...] = (out + b_ref[2:3, :action]).astype(o_ref.dtype)


# ---------------------------------------------------------------------------
# Parameter prep: weights -> bf16 (natural shapes), biases packed into one
# small f32 array so the kernel takes 5 inputs instead of 7.
# ---------------------------------------------------------------------------
def prepare_params(w1, b1, w2, b2, w3, b3):
    """Weights are (in, out) layout (transposed vs. PyTorch Linear)."""
    hidden_dim = w1.shape[1]
    action_dim = w3.shape[1]
    bw = max(hidden_dim, action_dim)

    w1b = w1.astype(jnp.bfloat16)
    w2b = w2.astype(jnp.bfloat16)
    w3b = w3.astype(jnp.bfloat16)

    bpack = jnp.zeros((SUB, bw), jnp.float32)
    bpack = bpack.at[0, :hidden_dim].set(b1.reshape(-1).astype(jnp.float32))
    bpack = bpack.at[1, :hidden_dim].set(b2.reshape(-1).astype(jnp.float32))
    bpack = bpack.at[2, :action_dim].set(b3.reshape(-1).astype(jnp.float32))
    return w1b, w2b, w3b, bpack


# ---------------------------------------------------------------------------
# Forward wrapper: batch-tiled pallas_call, weights VMEM-resident.
# ---------------------------------------------------------------------------
@functools.partial(jax.jit, static_argnames=("block_rows",))
def qnet_forward(x, w1, w2, w3, bpack, *, block_rows=2048):
    B, state_dim = x.shape
    hidden_dim = w1.shape[1]
    action_dim = w3.shape[1]

    # Pad the batch only up to a multiple of 8 (sublane), and only if needed.
    bp = _round_up(B, SUB)
    xp = x if bp == B else jnp.pad(x, ((0, bp - B), (0, 0)))

    # Batch row tile: multiple of 8, capped at the (padded) batch.
    tm = min(_round_up(block_rows, SUB), bp)
    # v7x: make sure there are >= 2 grid steps (when possible) so the
    # "parallel" batch axis is sharded across both TensorCores.
    if pl.cdiv(bp, tm) < 2 and bp >= 2 * SUB:
        tm = _round_up(pl.cdiv(bp, 2), SUB)
    grid = (pl.cdiv(bp, tm),)   # tail tile handled by Pallas boundary masking

    out = pl.pallas_call(
        _qnet_kernel,
        out_shape=jax.ShapeDtypeStruct((bp, action_dim), jnp.float32),
        grid=grid,
        in_specs=[
            # x: tiled over the batch grid axis; full (unpadded) feature dim.
            pl.BlockSpec((tm, state_dim), lambda i: (i, 0)),
            # Weights / packed biases: same block every step -> VMEM-resident.
            pl.BlockSpec((state_dim, hidden_dim), lambda i: (0, 0)),
            pl.BlockSpec((hidden_dim, hidden_dim), lambda i: (0, 0)),
            pl.BlockSpec((hidden_dim, action_dim), lambda i: (0, 0)),
            pl.BlockSpec(bpack.shape, lambda i: (0, 0)),
        ],
        out_specs=pl.BlockSpec((tm, action_dim), lambda i: (i, 0)),
        compiler_params=pltpu.CompilerParams(
            dimension_semantics=("parallel",)),  # megacore sharding on v7x
    )(xp, w1, w2, w3, bpack)

    return out if bp == B else out[:B]


# ---------------------------------------------------------------------------
# Init + pure-JAX references (PyTorch nn.Linear default init semantics).
# ---------------------------------------------------------------------------
def init_qnet_params(key, state_dim, hidden_dim, action_dim):
    ks = jax.random.split(key, 6)

    def linear(kw, kb, fan_in, fan_out):
        bound = 1.0 / jnp.sqrt(jnp.float32(fan_in))
        # stored as (in, out) so the kernel computes x @ W
        w = jax.random.uniform(kw, (fan_in, fan_out), jnp.float32, -bound, bound)
        b = jax.random.uniform(kb, (1, fan_out), jnp.float32, -bound, bound)
        return w, b

    w1, b1 = linear(ks[0], ks[1], state_dim, hidden_dim)
    w2, b2 = linear(ks[2], ks[3], hidden_dim, hidden_dim)
    w3, b3 = linear(ks[4], ks[5], hidden_dim, action_dim)
    return w1, b1, w2, b2, w3, b3


def qnet_reference_f32(x, w1, b1, w2, b2, w3, b3):
    h1 = jnp.maximum(x @ w1 + b1, 0.0)
    h2 = jnp.maximum(h1 @ w2 + b2, 0.0)
    return h2 @ w3 + b3


def qnet_reference_bf16(x, w1, b1, w2, b2, w3, b3):
    """Mirrors the kernel's bf16-input / f32-accumulate numerics."""
    def r(a):
        return a.astype(jnp.bfloat16).astype(jnp.float32)
    h = jnp.maximum(r(x) @ r(w1) + b1, 0.0)
    h = jnp.maximum(r(h) @ r(w2) + b2, 0.0)
    return r(h) @ r(w3) + b3


if __name__ == "__main__":
    state_dim, hidden_dim, action_dim = 16, 32, 4

    key = jax.random.PRNGKey(0)
    k_x1, k_x2, k_p = jax.random.split(key, 3)
    params = init_qnet_params(k_p, state_dim, hidden_dim, action_dim)
    prepped = prepare_params(*params)

    # Small-batch case (single grid step).
    x_small = jax.random.normal(k_x1, (8, state_dim), jnp.float32)
    out_small = jax.block_until_ready(qnet_forward(x_small, *prepped))
    assert out_small.shape == (8, action_dim)
    ref_b = qnet_reference_bf16(x_small, *params)
    ref_f = qnet_reference_f32(x_small, *params)
    assert jnp.allclose(out_small, ref_b, atol=2e-3, rtol=2e-3), \
        "small-batch mismatch vs bf16-rounded reference"
    assert jnp.allclose(out_small, ref_f, atol=5e-2, rtol=5e-2), \
        "small-batch mismatch vs f32 reference"

    # Non-multiple batch: exercises the batch-pad-to-8 path, the partial
    # (masked) tail tile, and the >=2-step grid split for v7x.
    x_big = jax.random.normal(k_x2, (300, state_dim), jnp.float32)
    out_big = jax.block_until_ready(qnet_forward(x_big, *prepped))
    assert out_big.shape == (300, action_dim)
    ref_b = qnet_reference_bf16(x_big, *params)
    ref_f = qnet_reference_f32(x_big, *params)
    assert jnp.allclose(out_big, ref_b, atol=2e-3, rtol=2e-3), \
        "batched mismatch vs bf16-rounded reference"
    assert jnp.allclose(out_big, ref_f, atol=5e-2, rtol=5e-2), \
        "batched mismatch vs f32 reference"

    # Explicit small tile: multiple grid steps with a partial tail block.
    out_tiled = jax.block_until_ready(qnet_forward(x_big, *prepped,
                                                   block_rows=128))
    assert jnp.allclose(out_tiled, ref_b, atol=2e-3, rtol=2e-3), \
        "tiled mismatch vs bf16-rounded reference"

    print("KERNEL_OK")
</pallas_src>

<mosaic_0001>
module attributes {stable_mosaic.version = 11 : i64} {
  func.func @_qnet_kernel(%arg0: i32, %arg1: memref<8x16xf32, #tpu.memory_space<vmem>>, %arg2: memref<16x32xbf16, #tpu.memory_space<vmem>>, %arg3: memref<32x32xbf16, #tpu.memory_space<vmem>>, %arg4: memref<32x4xbf16, #tpu.memory_space<vmem>>, %arg5: memref<8x32xf32, #tpu.memory_space<vmem>>, %arg6: memref<8x4xf32, #tpu.memory_space<vmem>>) attributes {dimension_semantics = [#tpu.dimension_semantics<parallel>], iteration_bounds = array<i64: 1>, scalar_prefetch = 0 : i64, scratch_operands = 0 : i64, tpu.core_type = #tpu.core_type<tc>, window_params = [{transform_indices = @transform_0, window_bounds = array<i64: 8, 16>}, {pipeline_mode = #tpu.pipeline_mode<synchronous>, transform_indices = @transform_1, window_bounds = array<i64: 16, 32>}, {pipeline_mode = #tpu.pipeline_mode<synchronous>, transform_indices = @transform_2, window_bounds = array<i64: 32, 32>}, {pipeline_mode = #tpu.pipeline_mode<synchronous>, transform_indices = @transform_3, window_bounds = array<i64: 32, 4>}, {pipeline_mode = #tpu.pipeline_mode<synchronous>, transform_indices = @transform_4, window_bounds = array<i64: 8, 32>}, {transform_indices = @transform_5, window_bounds = array<i64: 8, 4>}]} {
    %c0 = arith.constant 0 : index
    %c0_0 = arith.constant 0 : index
    %0 = vector.load %arg1[%c0, %c0_0] : memref<8x16xf32, #tpu.memory_space<vmem>>, vector<8x16xf32>
    %1 = arith.truncf %0 : vector<8x16xf32> to vector<8x16xbf16>
    %c0_1 = arith.constant 0 : index
    %c0_2 = arith.constant 0 : index
    %2 = vector.load %arg2[%c0_1, %c0_2] : memref<16x32xbf16, #tpu.memory_space<vmem>>, vector<16x32xbf16>
    %cst = arith.constant dense<0.000000e+00> : vector<8x32xf32>
    %3 = tpu.matmul %1, %2, %cst {dimension_numbers = #tpu.dot_dimension_numbers<[1], [0], [0], [1], [0, 0, 1, 1], [], []>} : vector<8x16xbf16>, vector<16x32xbf16>, vector<8x32xf32> -> vector<8x32xf32>
    %c0_3 = arith.constant 0 : index
    %c0_4 = arith.constant 0 : index
    %4 = vector.load %arg5[%c0_3, %c0_4] : memref<8x32xf32, #tpu.memory_space<vmem>>, vector<1x32xf32>
    %5 = vector.broadcast %4 : vector<1x32xf32> to vector<8x32xf32>
    %6 = arith.addf %3, %5 : vector<8x32xf32>
    %cst_5 = arith.constant 0.000000e+00 : f32
    %7 = vector.broadcast %cst_5 : f32 to vector<8x32xf32>
    %8 = arith.maximumf %6, %7 : vector<8x32xf32>
    %9 = arith.truncf %8 : vector<8x32xf32> to vector<8x32xbf16>
    %c0_6 = arith.constant 0 : index
    %c0_7 = arith.constant 0 : index
    %10 = vector.load %arg3[%c0_6, %c0_7] : memref<32x32xbf16, #tpu.memory_space<vmem>>, vector<32x32xbf16>
    %cst_8 = arith.constant dense<0.000000e+00> : vector<8x32xf32>
    %11 = tpu.matmul %9, %10, %cst_8 {dimension_numbers = #tpu.dot_dimension_numbers<[1], [0], [0], [1], [0, 0, 1, 1], [], []>} : vector<8x32xbf16>, vector<32x32xbf16>, vector<8x32xf32> -> vector<8x32xf32>
    %c1 = arith.constant 1 : index
    %c0_9 = arith.constant 0 : index
    %12 = vector.load %arg5[%c1, %c0_9] : memref<8x32xf32, #tpu.memory_space<vmem>>, vector<1x32xf32>
    %13 = vector.broadcast %12 : vector<1x32xf32> to vector<8x32xf32>
    %14 = arith.addf %11, %13 : vector<8x32xf32>
    %cst_10 = arith.constant 0.000000e+00 : f32
    %15 = vector.broadcast %cst_10 : f32 to vector<8x32xf32>
    %16 = arith.maximumf %14, %15 : vector<8x32xf32>
    %17 = arith.truncf %16 : vector<8x32xf32> to vector<8x32xbf16>
    %c0_11 = arith.constant 0 : index
    %c0_12 = arith.constant 0 : index
    %18 = vector.load %arg4[%c0_11, %c0_12] : memref<32x4xbf16, #tpu.memory_space<vmem>>, vector<32x4xbf16>
    %cst_13 = arith.constant dense<0.000000e+00> : vector<8x4xf32>
    %19 = tpu.matmul %17, %18, %cst_13 {dimension_numbers = #tpu.dot_dimension_numbers<[1], [0], [0], [1], [0, 0, 1, 1], [], []>} : vector<8x32xbf16>, vector<32x4xbf16>, vector<8x4xf32> -> vector<8x4xf32>
    %c2 = arith.constant 2 : index
    %c0_14 = arith.constant 0 : index
    %20 = vector.load %arg5[%c2, %c0_14] : memref<8x32xf32, #tpu.memory_space<vmem>>, vector<1x4xf32>
    %21 = vector.broadcast %20 : vector<1x4xf32> to vector<8x4xf32>
    %22 = arith.addf %19, %21 : vector<8x4xf32>
    %c0_15 = arith.constant 0 : index
    %c0_16 = arith.constant 0 : index
    %23 = vector.load %arg6[%c0_15, %c0_16] : memref<8x4xf32, #tpu.memory_space<vmem>>, vector<8x4xf32>
    tpu.vector_store %arg6[%c0_15, %c0_16], %22 {strides = array<i32>} : memref<8x4xf32, #tpu.memory_space<vmem>>, vector<8x4xf32>,
    return
  }
  func.func @transform_0(%arg0: i32) -> (i32, i32) {
    %c0_i32 = arith.constant 0 : i32
    %c0_i32_0 = arith.constant 0 : i32
    return %arg0, %c0_i32 : i32, i32
  }
  func.func @transform_1(%arg0: i32) -> (i32, i32) {
    %c0_i32 = arith.constant 0 : i32
    %c0_i32_0 = arith.constant 0 : i32
    %c0_i32_1 = arith.constant 0 : i32
    return %c0_i32, %c0_i32_0 : i32, i32
  }
  func.func @transform_2(%arg0: i32) -> (i32, i32) {
    %c0_i32 = arith.constant 0 : i32
    %c0_i32_0 = arith.constant 0 : i32
    %c0_i32_1 = arith.constant 0 : i32
    return %c0_i32, %c0_i32_0 : i32, i32
  }
  func.func @transform_3(%arg0: i32) -> (i32, i32) {
    %c0_i32 = arith.constant 0 : i32
    %c0_i32_0 = arith.constant 0 : i32
    %c0_i32_1 = arith.constant 0 : i32
    return %c0_i32, %c0_i32_0 : i32, i32
  }
  func.func @transform_4(%arg0: i32) -> (i32, i32) {
    %c0_i32 = arith.constant 0 : i32
    %c0_i32_0 = arith.constant 0 : i32
    %c0_i32_1 = arith.constant 0 : i32
    return %c0_i32, %c0_i32_0 : i32, i32
  }
  func.func @transform_5(%arg0: i32) -> (i32, i32) {
    %c0_i32 = arith.constant 0 : i32
    %c0_i32_0 = arith.constant 0 : i32
    return %arg0, %c0_i32 : i32, i32
  }
}

</mosaic_0001>

<bundles_post_ra>
// kernel: qnet_forward.1
= control target key start
LH: loop header
LB: loop body
LE: loop exit
PB: predicated region body
PF: predicated region fallthrough
CT: control target
= control target key end

     0   :  { %10 = vsyncpa [#allocation3], 0  ;;  %s345_s0 = inlined_call_operand.hbm [shape: f32[8,16], index: 0, kind: input, shape index: {}]   ;;  %s346_s1 = inlined_call_operand.hbm [shape: bf16[16,32], index: 1, kind: input, shape index: {}]   ;;  %s347_s2 = inlined_call_operand.vmem [shape: bf16[32,32], index: 2, kind: input, shape index: {}]   ;;  %s348_s3 = inlined_call_operand.vmem [shape: bf16[32,4], index: 3, kind: input, shape index: {}]   ;;  %s349_s4 = inlined_call_operand.hbm [shape: f32[8,32], index: 4, kind: input, shape index: {}]   ;;  %s350_s5 = inlined_call_operand.vmem [shape: f32[8,4], index: 5, kind: output, shape index: {}]  }
   0x1   :  { %11 = vsyncpa [#allocation5], 0  ;;  %s27_s20 = sshll.u32 %s346_s1, 4  ;;  %s286_s21 = smov [#allocation4]   ;;  %s28_s20 = int_to_ptr.hbm [resolvable:$true] %s27_s20 }
   0x2   :  { %s29_s22 = sshll.u32 %s286_s21, 4  ;;  %s17_s25 = sshll.u32 %s345_s0, 4  ;;  %s30_s22 = int_to_ptr.vmem [resolvable:$true] %s29_s22  ;;  %s18_s25 = int_to_ptr.hbm [resolvable:$true] %s17_s25 }
   0x3   :  { %s287_s26 = smov 64   ;;  %s288_s27 = smov 4  }
   0x4   :  { %35 = dma.hbm_to_vmem [thread:$0]  %s28_s20, 128, %s30_s22, [#allocation5], %s287_s26, %s287_s26, %s288_s27  }
   0x5   :  { %s289_s28 = smov [#allocation2]   ;;  %s45_s7 = sshll.u32 %s349_s4, 4  ;;  %s46_s7 = int_to_ptr.hbm [resolvable:$true] %s45_s7 }
   0x6   :  { %s19_s29 = sshll.u32 %s289_s28, 4  ;;  %s290_s1 = smov [#allocation6]   ;;  %s20_s29 = int_to_ptr.vmem [resolvable:$true] %s19_s29 }
   0x7   :  { %22 = dma.hbm_to_vmem [thread:$0]  %s18_s25, 128, %s20_s29, [#allocation3]  }
   0x8   :  { %s47_s8 = sshll.u32 %s290_s1, 4  ;;  %s48_s8 = int_to_ptr.vmem [resolvable:$true] %s47_s8 }
   0x9   :  { %50 = dma.hbm_to_vmem [thread:$0]  %s46_s7, 128, %s48_s8, [#allocation5]  }
   0xa   :  { %282 = dma.done.wait [#allocation3], 128  }
   0xb   :  { %283 = vsyncadd [#allocation3], 4294967168 }
   0xc   :  { %284 = dma.done.wait [#allocation5], 256  }
   0xd   :  { %285 = vsyncadd [#allocation5], 4294967040  ;;  %v197_v0 = vld [vmem:[#allocation4] sm:$0xff]  ;;  %v64_v1 = vld [vmem:[#allocation2] sm:$0xff]  ;;  %vm76_vm0 = vcmask 130048   ;;  %vm113_vm1 = vcmask 261120  }
   0xe   :  { %v65_v2 = vpack.c.bf16 %v64_v1, %v64_v1  ;;  %87 = vmatpush.bf16.msra.mxu0 %v197_v0  ;;  %v199_v3 = vld [vmem:[%s347_s2 + $0x8] sm:$0xff]  ;;  %v198_v4 = vld [vmem:[%s347_s2] sm:$0xff]  ;;  %v207_v5 = vld [vmem:[#allocation6] ss:$0 sm:$0xff]  ;;  %vm166_vm2 = vcmask 31744  }
   0xf   :  { %123 = vmatpush.bf16.msra.mxu1 %v199_v3  ;;  %v201_v11 = vld [vmem:[%s348_s3 + $0x8] sm:$0xff]  ;;  %v200_v12 = vld [vmem:[%s348_s3] sm:$0xff]  ;;  %v208_v13 = vld [vmem:[#allocation6 + $0x1] ss:$0 sm:$0xff] }
  0x10   :  { %159 = vmatpush.bf16.msra.mxu2 %v201_v11  ;;  %v209_v19 = vld [vmem:[#allocation6 + $0x2] ss:$0 sm:$0xff] }
  0x11   :  { %178 = vmatmul.msk.bf16.vlgmr.msra.gmra.mxu0 %vm76_vm0, %v65_v2 }
  0x13   :  { %124 = vmatpush.bf16.msra.mxu1 %v198_v4 }
  0x14   :  { %160 = vmatpush.bf16.msra.mxu2 %v200_v12 }
  0x8e   :  { %v89_v6 = vpop.f32.mrf.mxu0 }
  0x8f   :  { %v90_v7 = vadd.f32 %v207_v5, %v89_v6 }
  0x91   :  { %v93_v8 = vmax.f32 %v90_v7, 0.0 }
  0x93   :  { %v94_v9 = vpack.c.bf16 %v93_v8, %v93_v8 }
  0x95   :  { %187 = vmatmul.msk.bf16.vlgmr.msra.gmra.mxu1 %vm113_vm1, %v94_v9 }
  0x96   :  { %v91_v10 = vpop.f32.mrf.mxu0 }
 0x112   :  { %v126_v14 = vpop.f32.mrf.mxu1 }
 0x113   :  { %v127_v15 = vadd.f32 %v208_v13, %v126_v14 }
 0x115   :  { %v130_v16 = vmax.f32 %v127_v15, 0.0 }
 0x117   :  { %v131_v17 = vpack.c.bf16 %v130_v16, %v130_v16 }
 0x119   :  { %196 = vmatmul.msk.bf16.vlgmr.msra.gmra.mxu2 %vm113_vm1, %v131_v17 }
 0x11a   :  { %v128_v18 = vpop.f32.mrf.mxu1 }
 0x19c   :  { %v162_v20 = vpop.f32.mrf.mxu2 }
 0x19d   :  { %v163_v21 = vadd.f32 %v209_v19, %v162_v20 }
 0x19f   :  { %167 = vst.msk [vmem:[%s350_s5] sm:$0xff] %vm166_vm2, %v163_v21 }
 0x1a4   :  { %v164_v22 = vpop.f32.mrf.mxu2 }
 0x1a5   :  { %172 = vsyncpa [#allocation3], 1 }
 0x1a6   :  { %173 = vsyncpa [#allocation5], 1 }

</bundles_post_ra>
